<compile_context>
chip_gen: v7x
topology: tpu7x:2x2x1
jax: 0.10.0
libtpu: 0.0.40
codegen_flags: <defaults>
</compile_context>

<pallas_src>
import jax
import jax.numpy as jnp
from jax.experimental import pallas as pl
from jax.experimental.pallas import tpu as pltpu


def _round_up(x, m):
    return (x + m - 1) // m * m


def _divisors_mult(total, mult, cap):
    """Divisors of `total` that are multiples of `mult` and <= cap, descending."""
    out = []
    d = mult
    while d <= total:
        if total % d == 0 and d <= cap:
            out.append(d)
        d += mult
    if not out:
        out = [mult]
    return sorted(out, reverse=True)


def _vmem_budget():
    """(tile budget, vmem_limit_bytes) per TPU generation."""
    try:
        cap = pltpu.get_tpu_info().vmem_capacity_bytes
    except Exception:
        cap = 64 * 1024 * 1024  # conservative (v7x-sized) fallback
    if cap >= 128 * 1024 * 1024:          # v5e / v6e
        return 96 * 1024 * 1024, 110 * 1024 * 1024
    else:                                  # v7x (64 MiB per TC)
        return 44 * 1024 * 1024, 48 * 1024 * 1024


def _pick_tiles(M_a, nf_a, Tp, in_it, out_it, row_align, budget, split_t):
    """Pick (tm, tk, tt) as divisors of the aligned dims, shrinking tk first, tm last."""
    tm_c = _divisors_mult(M_a, row_align, min(M_a, 1024))
    tk_c = _divisors_mult(nf_a, 128, nf_a)          # grow K toward full nf
    tt_c = _divisors_mult(Tp, 128, Tp)

    tm = tm_c[0]
    tk = tk_c[0]
    if split_t and Tp >= 256:
        # Single m tile: split output columns so both v7x TensorCores have work.
        half = [d for d in tt_c if d <= Tp // 2]
        tt = half[0] if half else tt_c[0]
    else:
        tt = tt_c[0]

    def usage(tm_, tk_, tt_):
        return (2 * tm_ * tk_ * in_it        # x tile, double-buffered
                + 2 * tk_ * tt_ * in_it      # weight tile, double-buffered
                + 2 * tm_ * tt_ * out_it     # out tile, double-buffered
                + tm_ * tt_ * 4              # f32 accumulator scratch
                + 2 * tt_ * 4)               # bias (tiny)

    # Shrink K first (changes no HBM bytes, only ~0.35us/step grid overhead) ...
    for cand in tk_c:
        tk = cand
        if usage(tm, tk, tt) <= budget:
            break
    # ... then M (re-streams the dominant weight tensor per m tile) ...
    for cand in tm_c:
        tm = cand
        if usage(tm, tk, tt) <= budget:
            break
    # ... then T as a last resort (shrinks accumulator / out tile).
    for cand in tt_c:
        if cand > tt:
            continue
        tt = cand
        if usage(tm, tk, tt) <= budget:
            break
    return tm, tk, tt


def _flatten_head_kernel(x_ref, w_ref, b_ref, o_ref, acc_ref):
    # x_ref: [tm, tk]   w_ref: [tk, tt]   b_ref: [1, tt] (f32)
    # o_ref: [tm, tt]   acc_ref: VMEM [tm, tt] f32
    k = pl.program_id(2)

    @pl.when(k == 0)
    def _():
        # Fold the bias into the accumulator init (no finalize VPU pass needed).
        acc_ref[...] = jnp.broadcast_to(b_ref[...], acc_ref.shape)

    # Standard contraction: x last dim vs weight FIRST dim -> MXU-native layout,
    # no per-step XLU relayout of the weight tile.
    acc_ref[...] += jnp.dot(x_ref[...], w_ref[...], preferred_element_type=jnp.float32)

    @pl.when(k == pl.num_programs(2) - 1)
    def _():
        o_ref[...] = acc_ref[...].astype(o_ref.dtype)


def _flatten_head_apply(x, w_pad, b_pad, T, nf, compute_dtype):
    B, n_vars, d_model, patch_num = x.shape
    assert d_model * patch_num == nf

    out_dtype = x.dtype
    in_it = jnp.dtype(compute_dtype).itemsize
    out_it = jnp.dtype(out_dtype).itemsize
    row_align = 8 if in_it >= 4 else 16          # f32 -> 8 sublanes, bf16 -> 16

    nf_a, Tp = w_pad.shape
    M = B * n_vars
    M_a = _round_up(M, row_align)

    # If the best divisor-tile for M is tiny, pad rows up instead (avoids re-streaming
    # the weight once per tiny m tile).
    tm_best = _divisors_mult(M_a, row_align, min(M_a, 1024))[0]
    if tm_best < min(M_a, 512):
        M_a = _round_up(M_a, 512)

    budget, vmem_limit = _vmem_budget()
    split_t = M_a <= 1024                        # single m tile -> use the T axis for megacore
    tm, tk, tt = _pick_tiles(M_a, nf_a, Tp, in_it, out_it, row_align, budget, split_t)

    x2d = x.reshape(M, nf).astype(compute_dtype)
    if M_a != M or nf_a != nf:
        x_in = jnp.zeros((M_a, nf_a), compute_dtype).at[:M, :nf].set(x2d)
    else:
        x_in = x2d                               # aligned: no padded copy materialized

    grid = (M_a // tm, Tp // tt, nf_a // tk)
    n_m, n_t, _ = grid

    out = pl.pallas_call(
        _flatten_head_kernel,
        out_shape=jax.ShapeDtypeStruct((M_a, Tp), out_dtype),
        grid_spec=pltpu.PrefetchScalarGridSpec(
            num_scalar_prefetch=0,
            grid=grid,
            in_specs=[
                pl.BlockSpec((tm, tk), lambda m, t, k: (m, k)),   # x tile
                pl.BlockSpec((tk, tt), lambda m, t, k: (k, t)),   # weight tile [K, T]
                pl.BlockSpec((1, tt), lambda m, t, k: (0, t)),    # bias slice
            ],
            out_specs=pl.BlockSpec((tm, tt), lambda m, t, k: (m, t)),
            scratch_shapes=[pltpu.VMEM((tm, tt), jnp.float32)],
        ),
        compiler_params=pltpu.CompilerParams(
            dimension_semantics=("parallel", "parallel", "arbitrary"),
            vmem_limit_bytes=vmem_limit,
        ),
        cost_estimate=pl.CostEstimate(
            flops=2 * M_a * nf_a * Tp,
            transcendentals=0,
            bytes_accessed=(n_m * Tp * nf_a * in_it      # weight streamed once per m tile
                            + n_t * M_a * nf_a * in_it   # x streamed once per t tile
                            + M_a * Tp * out_it),
        ),
    )(x_in, w_pad, b_pad)

    # TODO(synk): dropout(head_dropout) omitted — p=0 / eval mode is identity.
    return out[:M, :T].reshape(B, n_vars, T)


def make_flatten_head(weight, bias, *, compute_dtype=jnp.bfloat16):
    """Prepare FlattenHead params ONCE (cast + transpose + pad) and return an apply fn.

    weight: [target_window, nf] (PyTorch nn.Linear layout), bias: [target_window].
    Returns fn(x: [B, n_vars, d_model, patch_num]) -> [B, n_vars, target_window].
    """
    T, nf = weight.shape
    assert bias.shape == (T,)
    nf_a = _round_up(nf, 128)
    Tp = _round_up(T, 128)

    # [T, nf] -> padded [nf_a, Tp]: contraction on sublanes, T on lanes (MXU-native).
    w_pad = (jnp.zeros((nf_a, Tp), compute_dtype)
             .at[:nf, :T].set(weight.T.astype(compute_dtype)))
    b_pad = jnp.zeros((1, Tp), jnp.float32).at[0, :T].set(bias.astype(jnp.float32))

    def apply(x):
        return _flatten_head_apply(x, w_pad, b_pad, T, nf, compute_dtype)

    return apply


def flatten_head(x, weight, bias, *, compute_dtype=jnp.bfloat16):
    """One-shot convenience wrapper (prefer make_flatten_head to hoist the param prep)."""
    return make_flatten_head(weight, bias, compute_dtype=compute_dtype)(x)


if __name__ == "__main__":
    # Small shapes consistent with the module:
    #   B=2, n_vars=4, d_model=8, patch_num=4 -> nf=32, target_window=16
    # (Production tuning happens automatically at real CMamba shapes.)
    B, n_vars, d_model, patch_num = 2, 4, 8, 4
    nf = d_model * patch_num
    target_window = 16

    key = jax.random.PRNGKey(0)
    kx, kw, kb = jax.random.split(key, 3)

    x = jax.random.normal(kx, (B, n_vars, d_model, patch_num), dtype=jnp.float32)

    # Deterministic Linear params (PyTorch-style uniform(-1/sqrt(nf), 1/sqrt(nf))).
    bound = 1.0 / (nf ** 0.5)
    weight = jax.random.uniform(kw, (target_window, nf), jnp.float32, -bound, bound)
    bias = jax.random.uniform(kb, (target_window,), jnp.float32, -bound, bound)

    ref = x.reshape(B, n_vars, nf) @ weight.T + bias

    # f32 compute path: exact-ish check.
    head_f32 = make_flatten_head(weight, bias, compute_dtype=jnp.float32)
    y_f32 = head_f32(x)
    jax.block_until_ready(y_f32)
    assert y_f32.shape == (B, n_vars, target_window)
    assert jnp.allclose(y_f32, ref, atol=1e-5, rtol=1e-5)

    # Default bf16 compute path (recommended mem-bound production path): f32 accumulation.
    head_bf16 = make_flatten_head(weight, bias)
    y_bf16 = head_bf16(x)
    jax.block_until_ready(y_bf16)
    assert y_bf16.shape == (B, n_vars, target_window)
    assert jnp.allclose(y_bf16.astype(jnp.float32), ref, atol=5e-2, rtol=5e-2)

    print("KERNEL_OK")
</pallas_src>

<mosaic_0001>
module attributes {stable_mosaic.version = 11 : i64} {
  func.func @_flatten_head_kernel(%arg0: i32, %arg1: i32, %arg2: i32, %arg3: memref<8x128xf32, #tpu.memory_space<vmem>>, %arg4: memref<128x128xf32, #tpu.memory_space<vmem>>, %arg5: memref<1x128xf32, #tpu.memory_space<vmem>>, %arg6: memref<8x128xf32, #tpu.memory_space<vmem>>, %arg7: memref<8x128xf32, #tpu.memory_space<vmem>>) attributes {dimension_semantics = [#tpu.dimension_semantics<parallel>, #tpu.dimension_semantics<parallel>, #tpu.dimension_semantics<arbitrary>], iteration_bounds = array<i64: 1, 1, 1>, scalar_prefetch = 0 : i64, scratch_operands = 1 : i64, tpu.core_type = #tpu.core_type<tc>, window_params = [{transform_indices = @transform_0, window_bounds = array<i64: 8, 128>}, {transform_indices = @transform_1, window_bounds = array<i64: 128, 128>}, {transform_indices = @transform_2, window_bounds = array<i64: 1, 128>}, {transform_indices = @transform_3, window_bounds = array<i64: 8, 128>}]} {
    %c0_i32 = arith.constant 0 : i32
    %0 = arith.cmpi eq, %arg2, %c0_i32 : i32
    %1 = arith.extui %0 : i1 to i32
    %c0_i32_0 = arith.constant 0 : i32
    %2 = arith.cmpi ne, %1, %c0_i32_0 : i32
    scf.if %2 {
      %c0_10 = arith.constant 0 : index
      %c0_11 = arith.constant 0 : index
      %12 = vector.load %arg5[%c0_10, %c0_11] : memref<1x128xf32, #tpu.memory_space<vmem>>, vector<1x128xf32>
      %13 = vector.shape_cast %12 : vector<1x128xf32> to vector<1x128xf32>
      %14 = vector.broadcast %13 : vector<1x128xf32> to vector<8x128xf32>
      %c0_12 = arith.constant 0 : index
      %c0_13 = arith.constant 0 : index
      %15 = vector.load %arg7[%c0_12, %c0_13] : memref<8x128xf32, #tpu.memory_space<vmem>>, vector<8x128xf32>
      tpu.vector_store %arg7[%c0_12, %c0_13], %14 {strides = array<i32>} : memref<8x128xf32, #tpu.memory_space<vmem>>, vector<8x128xf32>,
    } else {
    }
    %c0 = arith.constant 0 : index
    %c0_1 = arith.constant 0 : index
    %3 = vector.load %arg7[%c0, %c0_1] : memref<8x128xf32, #tpu.memory_space<vmem>>, vector<8x128xf32>
    %c0_2 = arith.constant 0 : index
    %c0_3 = arith.constant 0 : index
    %4 = vector.load %arg3[%c0_2, %c0_3] : memref<8x128xf32, #tpu.memory_space<vmem>>, vector<8x128xf32>
    %c0_4 = arith.constant 0 : index
    %c0_5 = arith.constant 0 : index
    %5 = vector.load %arg4[%c0_4, %c0_5] : memref<128x128xf32, #tpu.memory_space<vmem>>, vector<128x128xf32>
    %cst = arith.constant dense<0.000000e+00> : vector<8x128xf32>
    %6 = tpu.matmul %4, %5, %cst {dimension_numbers = #tpu.dot_dimension_numbers<[1], [0], [0], [1], [0, 0, 1, 1], [], []>} : vector<8x128xf32>, vector<128x128xf32>, vector<8x128xf32> -> vector<8x128xf32>
    %7 = arith.addf %3, %6 : vector<8x128xf32>
    %c0_6 = arith.constant 0 : index
    %c0_7 = arith.constant 0 : index
    %8 = vector.load %arg7[%c0_6, %c0_7] : memref<8x128xf32, #tpu.memory_space<vmem>>, vector<8x128xf32>
    tpu.vector_store %arg7[%c0_6, %c0_7], %7 {strides = array<i32>} : memref<8x128xf32, #tpu.memory_space<vmem>>, vector<8x128xf32>,
    %c0_i32_8 = arith.constant 0 : i32
    %9 = arith.cmpi eq, %arg2, %c0_i32_8 : i32
    %10 = arith.extui %9 : i1 to i32
    %c0_i32_9 = arith.constant 0 : i32
    %11 = arith.cmpi ne, %10, %c0_i32_9 : i32
    scf.if %11 {
      %c0_10 = arith.constant 0 : index
      %c0_11 = arith.constant 0 : index
      %12 = vector.load %arg7[%c0_10, %c0_11] : memref<8x128xf32, #tpu.memory_space<vmem>>, vector<8x128xf32>
      %c0_12 = arith.constant 0 : index
      %c0_13 = arith.constant 0 : index
      %13 = vector.load %arg6[%c0_12, %c0_13] : memref<8x128xf32, #tpu.memory_space<vmem>>, vector<8x128xf32>
      tpu.vector_store %arg6[%c0_12, %c0_13], %12 {strides = array<i32>} : memref<8x128xf32, #tpu.memory_space<vmem>>, vector<8x128xf32>,
    } else {
    }
    return
  }
  func.func @transform_0(%arg0: i32, %arg1: i32, %arg2: i32) -> (i32, i32) {
    %c0_i32 = arith.constant 0 : i32
    return %arg0, %arg2 : i32, i32
  }
  func.func @transform_1(%arg0: i32, %arg1: i32, %arg2: i32) -> (i32, i32) {
    %c0_i32 = arith.constant 0 : i32
    return %arg2, %arg1 : i32, i32
  }
  func.func @transform_2(%arg0: i32, %arg1: i32, %arg2: i32) -> (i32, i32) {
    %c0_i32 = arith.constant 0 : i32
    %c0_i32_0 = arith.constant 0 : i32
    return %c0_i32, %arg1 : i32, i32
  }
  func.func @transform_3(%arg0: i32, %arg1: i32, %arg2: i32) -> (i32, i32) {
    %c0_i32 = arith.constant 0 : i32
    return %arg0, %arg1 : i32, i32
  }
}

</mosaic_0001>

<bundles_post_ra>
// kernel: tpu_custom_call.1
= control target key start
LH: loop header
LB: loop body
LE: loop exit
PB: predicated region body
PF: predicated region fallthrough
CT: control target
= control target key end

     0   :  { %8 = vsyncpa [#allocation4], 0  ;;  %s395_s0 = inlined_call_operand.hbm [shape: f32[8,128], index: 0, kind: input, shape index: {}]   ;;  %s396_s1 = inlined_call_operand.hbm [shape: f32[128,128], index: 1, kind: input, shape index: {}]   ;;  %s397_s2 = inlined_call_operand.vmem [shape: f32[1,128], index: 2, kind: input, shape index: {}]   ;;  %s398_s3 = inlined_call_operand.hbm [shape: f32[8,128], index: 3, kind: output, shape index: {}]  }
   0x1   :  { %9 = vsyncpa [#allocation7], 0 }
   0x2   :  { %10 = vsyncpa [#allocation5], 0  ;;  %s321_s12 = smov [#allocation3]   ;;  %s322_s14 = smov [#allocation6]  }
   0x3   :  { %s17_s13 = sshll.u32 %s321_s12, 4  ;;  %s26_s15 = sshll.u32 %s322_s14, 4  ;;  %s18_s13 = int_to_ptr.vmem [resolvable:$true] %s17_s13  ;;  %s349_s15 = int_to_ptr.vmem [resolvable:$true] %s26_s15 }
   0x4   :  { %s249_s18 = scalar_lea.hbm %s395_s0, 128 }
   0x5   :  { %p250_p0 = scmp.ne.s32.totalorder %s395_s0, %s249_s18  ;;  %p253_p1 = scmp.lt.u32.totalorder %s249_s18, %s395_s0 }
   0x7   :  { %p255_p2 = pnand %p253_p1, %p250_p0 }
   0x9   :  { %258 = shalt.err (!%p255_p2)
}
   0xa   :  { %s259_s23 = scalar_lea.vmem %s18_s13, 128  ;;  %p264_p4 = scmp.lt.s32.totalorder %s18_s13, %s18_s13 }
   0xb   :  { %p260_p3 = scmp.ne.s32.totalorder %s18_s13, %s259_s23  ;;  %p265_p5 = scmp.lt.s32.totalorder %s259_s23, %s259_s23 }
   0xd   :  { %p266_p6 = por %p265_p5, %p264_p4 }
   0xf   :  { %p267_p7 = pnand %p266_p6, %p260_p3 }
  0x11   :  { %270 = shalt.err (!%p267_p7)
}
  0x12   :  { %20 = dma.hbm_to_vmem [thread:$0]  %s395_s0, 128, %s18_s13, [#allocation4]  }
  0x13   :  { %s271_s28 = scalar_lea.hbm %s396_s1, 2048 }
  0x14   :  { %p272_p8 = scmp.ne.s32.totalorder %s396_s1, %s271_s28  ;;  %p275_p9 = scmp.lt.u32.totalorder %s271_s28, %s396_s1 }
  0x16   :  { %p277_p10 = pnand %p275_p9, %p272_p8 }
  0x18   :  { %280 = shalt.err (!%p277_p10)
}
  0x19   :  { %s281_s6 = scalar_lea.vmem %s349_s15, 2048  ;;  %p286_p12 = scmp.lt.s32.totalorder %s349_s15, %s349_s15 }
  0x1a   :  { %p282_p11 = scmp.ne.s32.totalorder %s349_s15, %s281_s6  ;;  %p287_p13 = scmp.lt.s32.totalorder %s281_s6, %s281_s6 }
  0x1c   :  { %p288_p0 = por %p287_p13, %p286_p12 }
  0x1e   :  { %p289_p1 = pnand %p288_p0, %p282_p11 }
  0x20   :  { %292 = shalt.err (!%p289_p1)
}
  0x21   :  { %s323_s0 = smov 128   ;;  %s324_s7 = smov 8  }
  0x22   :  { %32 = dma.hbm_to_vmem [thread:$0]  %s396_s1, 2048, %s349_s15, [#allocation7], %s323_s0, %s323_s0, %s324_s7  }
  0x23   :  { %315 = dma.done.wait [#allocation4], 128  }
  0x24   :  { %316 = vsyncadd [#allocation4], 4294967168 }
  0x25   :  { %317 = dma.done.wait [#allocation7], 2048  }
  0x26   :  { %318 = vsyncadd [#allocation7], 4294965248  ;;  %v325_v0 = vmov 0.0|0.0   ;;  %vm326_vm0 = vmmov 0   ;;  %v327_v1 = vmov 0.0   ;;  %v55_v2 = vld [vmem:[#allocation6] sm:$0xff] }
  0x27   :  { %217 = vmatprep.subr.bf16.mxu0 %v325_v0  ;;  %214 = vmatprep.mubr.msk.f32.mxu0 %vm326_vm0, %v327_v1  ;;  %v56_v3 = vld [vmem:[#allocation6 + $0x8] sm:$0xff]  ;;  %v57_v4 = vld [vmem:[#allocation6 + $0x10] sm:$0xff]  ;;  %v58_v6 = vld [vmem:[#allocation6 + $0x18] sm:$0xff]  ;;  %s328_s11 = smov [#allocation8]  }
  0x28   :  { %v218_v5 = vpack.c.bf16 %v56_v3, %v55_v2  ;;  %v221_v7 = vpack.c.bf16 %v58_v6, %v57_v4  ;;  %v59_v8 = vld [vmem:[#allocation6 + $0x20] sm:$0xff]  ;;  %v60_v9 = vld [vmem:[#allocation6 + $0x28] sm:$0xff]  ;;  %v61_v11 = vld [vmem:[#allocation6 + $0x30] sm:$0xff]  ;;  %s154_s12 = sshll.u32 %s328_s11, 4  ;;  %s155_s12 = int_to_ptr.vmem [resolvable:$true] %s154_s12 }
  0x29   :  { %v224_v10 = vpack.c.bf16 %v60_v9, %v59_v8  ;;  %v62_v12 = vld [vmem:[#allocation6 + $0x38] sm:$0xff]  ;;  %v63_v14 = vld [vmem:[#allocation6 + $0x40] sm:$0xff]  ;;  %v64_v15 = vld [vmem:[#allocation6 + $0x48] sm:$0xff]  ;;  %s293_s13 = scalar_lea.vmem %s155_s12, 128  ;;  %p298_p3 = scmp.lt.s32.totalorder %s155_s12, %s155_s12 }
  0x2a   :  { %219 = vmatpush3.bf16.msra.mxu0 %v218_v5  ;;  %v227_v13 = vpack.c.bf16 %v62_v12, %v61_v11  ;;  %v230_v16 = vpack.c.bf16 %v64_v15, %v63_v14  ;;  %v65_v17 = vld [vmem:[#allocation6 + $0x50] sm:$0xff]  ;;  %v66_v18 = vld [vmem:[#allocation6 + $0x58] sm:$0xff]  ;;  %v67_v20 = vld [vmem:[#allocation6 + $0x60] sm:$0xff]  ;;  %p294_p2 = scmp.ne.s32.totalorder %s155_s12, %s293_s13  ;;  %p299_p4 = scmp.lt.s32.totalorder %s293_s13, %s293_s13 }
  0x2b   :  { %220 = vmatprep.subr.bf16.mxu0 %v325_v0  ;;  %v233_v19 = vpack.c.bf16 %v66_v18, %v65_v17  ;;  %v68_v21 = vld [vmem:[#allocation6 + $0x68] sm:$0xff]  ;;  %v69_v23 = vld [vmem:[#allocation6 + $0x70] sm:$0xff]  ;;  %v70_v24 = vld [vmem:[#allocation6 + $0x78] sm:$0xff] }
  0x2c   :  { %v236_v22 = vpack.c.bf16 %v68_v21, %v67_v20  ;;  %v239_v25 = vpack.c.bf16 %v70_v24, %v69_v23  ;;  %v54_v26 = vld [vmem:[#allocation3] sm:$0xff]  ;;  %p300_p5 = por %p299_p4, %p298_p3 }
  0x2d   :  { %v164_v27 = vld [vmem:[%s397_s2] ss:$0 sm:$0xff] }
  0x2e   :  { %222 = vmatpush3.bf16.msra.mxu0 %v221_v7  ;;  %p301_p6 = pnand %p300_p5, %p294_p2 }
  0x2f   :  { %223 = vmatprep.subr.bf16.mxu0 %v325_v0 }
  0x32   :  { %225 = vmatpush3.bf16.msra.mxu0 %v224_v10 }
  0x33   :  { %226 = vmatprep.subr.bf16.mxu0 %v325_v0 }
  0x36   :  { %228 = vmatpush3.bf16.msra.mxu0 %v227_v13 }
  0x37   :  { %229 = vmatprep.subr.bf16.mxu0 %v325_v0 }
  0x3a   :  { %231 = vmatpush3.bf16.msra.mxu0 %v230_v16 }
  0x3b   :  { %232 = vmatprep.subr.bf16.mxu0 %v325_v0 }
  0x3e   :  { %234 = vmatpush3.bf16.msra.mxu0 %v233_v19 }
  0x3f   :  { %235 = vmatprep.subr.bf16.mxu0 %v325_v0 }
  0x42   :  { %237 = vmatpush3.bf16.msra.mxu0 %v236_v22 }
  0x43   :  { %238 = vmatprep.subr.bf16.mxu0 %v325_v0 }
  0x46   :  { %240 = vmatpush3.bf16.msra.mxu0 %v239_v25 }
  0x49   :  { %215 = vmatmul.mubr.f32.vlgmr.msra.gmra.mrb[0].mxu0 %v54_v26 }
 0x11c   :  { %v137_v28 = vpop.f32.mrb[0].mxu0 }
 0x11d   :  { %v141_v29 = vadd.f32 %v164_v27, %v137_v28  ;;  %v216_v30 = vpop.f32.mrb[1].mxu0 }
 0x11f   :  { %147 = vst [vmem:[#allocation8] sm:$0xff] %v141_v29 }
 0x120   :  { %304 = shalt.err (!%p301_p6)
}
 0x121   :  { %s305_s16 = scalar_lea.hbm %s398_s3, 128 }
 0x122   :  { %p306_p7 = scmp.ne.s32.totalorder %s398_s3, %s305_s16  ;;  %p309_p8 = scmp.lt.u32.totalorder %s305_s16, %s398_s3 }
 0x124   :  { %p311_p9 = pnand %p309_p8, %p306_p7 }
 0x126   :  { %314 = shalt.err (!%p311_p9)
}
 0x127   :  { %157 = dma.vmem_to_hbm [thread:$0]  %s155_s12, 128, %s398_s3, [#allocation5]  }
 0x128   :  { %319 = dma.done.wait [#allocation5], 128  }
 0x129   :  { %320 = vsyncadd [#allocation5], 4294967168 }
 0x12a   :  { %161 = vsyncpa [#allocation4], 1 }
 0x12b   :  { %162 = vsyncpa [#allocation7], 1 }
 0x12c   :  { %163 = vsyncpa [#allocation5], 1 }

</bundles_post_ra>
